<compile_context>
chip_gen: v7x
topology: tpu7x:2x2x1
jax: 0.10.0
libtpu: 0.0.40
codegen_flags: <defaults>
</compile_context>

<pallas_src>
import functools
import math
from typing import NamedTuple

import jax
import jax.numpy as jnp
from jax.experimental import pallas as pl
from jax.experimental.pallas import tpu as pltpu

BN_EPS = 1e-5

# Conservative VMEM budget for tile selection: leaves headroom on v7x
# (64 MiB physical / 32 MiB scoped default) and is far under v5e/v6e physical.
_VMEM_BUDGET = 40 * 1024 * 1024
_TM_CAP = 256        # MXU M granularity; larger tm only bloats the f32 epilogue


def _round_up(x, m):
    return (x + m - 1) // m * m


def _vmem_need_bytes(tm, D, th, Op, multi_step):
    """Rough double-buffered VMEM footprint for one grid step."""
    need = 2 * (tm * D * 4          # x block (f32 in, cast to bf16 in-kernel)
                + D * th * 2        # W1 block (bf16)
                + 8 * th * 4        # b1 block (f32, sublane-padded)
                + th * Op * 2       # W2 block (bf16)
                + 8 * Op * 4        # b2 block (f32, sublane-padded)
                + tm * Op * 4)      # output block (f32)
    if multi_step:
        need += tm * Op * 4         # accumulator scratch
    return need


# --------------------------------------------------------------------------
# Fused MLP kernels:  out = [tanh(clamp(.))] ( relu(x @ W1 + b1) @ W2 + b2 )
# (BN already folded into W1 / b1 at param-prep time.)
# --------------------------------------------------------------------------

def _erm_fc_kernel_single(x_ref, w1_ref, b1_ref, w2_ref, b2_ref, o_ref, *,
                          apply_tanh):
    """Whole hidden dim in one step: no accumulator, no init/finalize."""
    x = x_ref[...].astype(jnp.bfloat16)                       # cast in-kernel
    h = jnp.dot(x, w1_ref[...], preferred_element_type=jnp.float32)
    h = jnp.maximum(h + b1_ref[...], 0.0)                     # f32 epilogue
    out = jnp.dot(h.astype(jnp.bfloat16), w2_ref[...],
                  preferred_element_type=jnp.float32)
    out = out + b2_ref[...]
    if apply_tanh:                                            # eval branch
        out = jnp.tanh(jnp.clip(out, -1.0, 1.0))
    o_ref[...] = out.astype(o_ref.dtype)


def _erm_fc_kernel_multi(x_ref, w1_ref, b1_ref, w2_ref, b2_ref, o_ref, acc_ref,
                         *, apply_tanh):
    """Hidden dim split across the last ('arbitrary') grid axis."""
    j = pl.program_id(1)

    @pl.when(j == 0)
    def _init():
        # Seed the accumulator with b2 so the finalize epilogue has no add.
        acc_ref[...] = jnp.broadcast_to(b2_ref[...], acc_ref.shape)

    x = x_ref[...].astype(jnp.bfloat16)
    h = jnp.dot(x, w1_ref[...], preferred_element_type=jnp.float32)
    h = jnp.maximum(h + b1_ref[...], 0.0)
    acc_ref[...] += jnp.dot(h.astype(jnp.bfloat16), w2_ref[...],
                            preferred_element_type=jnp.float32)

    @pl.when(j == pl.num_programs(1) - 1)
    def _fin():
        out = acc_ref[...]
        if apply_tanh:
            out = jnp.tanh(jnp.clip(out, -1.0, 1.0))
        o_ref[...] = out.astype(o_ref.dtype)


# --------------------------------------------------------------------------
# Param prep (done ONCE): fold BN into linear1, cast MXU operands to bf16,
# pick the hidden tile against the VMEM budget, and pre-pad everything.
# --------------------------------------------------------------------------

class ERMFCMeta(NamedTuple):
    in_dim: int        # D
    out_dim: int       # O (true, unpadded)
    hidden_tile: int   # th
    hidden_padded: int # Hp (multiple of th)
    out_padded: int    # Op (multiple of 128)


def _select_hidden_tile(D, H, Op):
    """Prefer a single reduction step (whole H) when it fits the VMEM budget."""
    hp_whole = _round_up(H, 128)
    if hp_whole <= 2048 and \
       _vmem_need_bytes(_TM_CAP, D, hp_whole, Op, False) <= _VMEM_BUDGET:
        return hp_whole, hp_whole                  # th == Hp  -> single step
    for th in (1024, 512, 256, 128):
        if _vmem_need_bytes(_TM_CAP, D, th, Op, True) <= _VMEM_BUDGET:
            return th, _round_up(H, th)
    return 128, _round_up(H, 128)


def prepare_params(params):
    w1, b1 = params["linear1_w"], params["linear1_b"]         # [H, D], [H]
    w2, b2 = params["linear2_w"], params["linear2_b"]         # [O, H], [O]
    gamma, beta, mean, var = params["bn1"]                    # each [H]

    H, D = w1.shape
    O = w2.shape[0]
    Op = _round_up(O, 128)
    th, Hp = _select_hidden_tile(D, H, Op)

    # Fold BN (running stats) into linear1 in f32, then cast MXU operands.
    scale = gamma / jnp.sqrt(var + BN_EPS)
    w1f = (w1.T * scale[None, :]).astype(jnp.bfloat16)        # [D, H]  bf16
    b1f = (beta + (b1 - mean) * scale).astype(jnp.float32)    # [H]     f32
    w2t = w2.T.astype(jnp.bfloat16)                           # [H, O]  bf16
    b2f = b2.astype(jnp.float32)

    # Zero padding is numerically inert: padded hidden columns get zero weight
    # and zero bias -> relu(0)=0 -> multiplied by zero W2 rows; padded output
    # lanes are sliced off after the kernel.
    w1_p = jnp.pad(w1f, ((0, 0), (0, Hp - H)))
    b1_p = jnp.pad(b1f.reshape(1, H), ((0, 0), (0, Hp - H)))
    w2_p = jnp.pad(w2t, ((0, Hp - H), (0, Op - O)))
    b2_p = jnp.pad(b2f.reshape(1, O), ((0, 0), (0, Op - O)))

    prepared = dict(w1=w1_p, b1=b1_p, w2=w2_p, b2=b2_p)
    meta = ERMFCMeta(in_dim=D, out_dim=O, hidden_tile=th,
                     hidden_padded=Hp, out_padded=Op)
    return prepared, meta


# --------------------------------------------------------------------------
# Forward wrapper: adaptive M tiling + pallas_call, fully jitted.
# --------------------------------------------------------------------------

def _pick_tm(Mp):
    # Guarantee >= 2 M tiles when the batch allows it (v7x megacore), never
    # exceed the MXU M granularity of 256.
    cap = min(_TM_CAP, max(8, Mp // 2)) if Mp >= 16 else _TM_CAP
    for cand in (256, 128, 64, 32, 16, 8):
        if cand <= cap and Mp % cand == 0:
            return cand
    return 8


@functools.partial(jax.jit, static_argnames=("meta", "train"))
def erm_fc_forward(x, prepared, meta, train=True):
    B, D = x.shape
    assert D == meta.in_dim
    th, Hp, Op, O = (meta.hidden_tile, meta.hidden_padded,
                     meta.out_padded, meta.out_dim)
    w1, b1, w2, b2 = prepared["w1"], prepared["b1"], prepared["w2"], prepared["b2"]

    # M tiling: tiny batches use a full-array block (no x pad at all);
    # larger batches are rounded to 8 and tiled for megacore sharding.
    if B <= 8:
        Mp, tm = B, B
        x_p = x
    else:
        Mp = _round_up(B, 8)
        tm = _pick_tm(Mp)
        x_p = jnp.pad(x, ((0, Mp - B), (0, 0))) if Mp != B else x

    grid_m = Mp // tm
    grid_h = Hp // th
    apply_tanh = not train

    vmem_need = _vmem_need_bytes(tm, D, th, Op, grid_h > 1)
    vmem_limit = int(min(max(2 * vmem_need, 16 * 1024 * 1024),
                         48 * 1024 * 1024))

    if grid_h == 1:
        # Fast path: whole hidden dim in one step, no accumulator scratch.
        out = pl.pallas_call(
            functools.partial(_erm_fc_kernel_single, apply_tanh=apply_tanh),
            out_shape=jax.ShapeDtypeStruct((Mp, Op), jnp.float32),
            grid_spec=pltpu.PrefetchScalarGridSpec(
                num_scalar_prefetch=0,
                grid=(grid_m,),
                in_specs=[
                    pl.BlockSpec((tm, D), lambda i: (i, 0)),    # x (f32)
                    pl.BlockSpec((D, Hp), lambda i: (0, 0)),    # W1 folded
                    pl.BlockSpec((1, Hp), lambda i: (0, 0)),    # b1 folded
                    pl.BlockSpec((Hp, Op), lambda i: (0, 0)),   # W2
                    pl.BlockSpec((1, Op), lambda i: (0, 0)),    # b2
                ],
                out_specs=pl.BlockSpec((tm, Op), lambda i: (i, 0)),
            ),
            compiler_params=pltpu.CompilerParams(
                dimension_semantics=("parallel",),
                vmem_limit_bytes=vmem_limit),
        )(x_p, w1, b1, w2, b2)
    else:
        # Multi-step reduction over the hidden dim (last, "arbitrary" axis).
        out = pl.pallas_call(
            functools.partial(_erm_fc_kernel_multi, apply_tanh=apply_tanh),
            out_shape=jax.ShapeDtypeStruct((Mp, Op), jnp.float32),
            grid_spec=pltpu.PrefetchScalarGridSpec(
                num_scalar_prefetch=0,
                grid=(grid_m, grid_h),
                in_specs=[
                    pl.BlockSpec((tm, D), lambda i, j: (i, 0)),
                    pl.BlockSpec((D, th), lambda i, j: (0, j)),
                    pl.BlockSpec((1, th), lambda i, j: (0, j)),
                    pl.BlockSpec((th, Op), lambda i, j: (j, 0)),
                    pl.BlockSpec((1, Op), lambda i, j: (0, 0)),
                ],
                out_specs=pl.BlockSpec((tm, Op), lambda i, j: (i, 0)),
                scratch_shapes=[pltpu.VMEM((tm, Op), jnp.float32)],
            ),
            compiler_params=pltpu.CompilerParams(
                dimension_semantics=("parallel", "arbitrary"),
                vmem_limit_bytes=vmem_limit),
        )(x_p, w1, b1, w2, b2)

    return out[:B, :O]


# --------------------------------------------------------------------------
# Pure-JAX reference (inference-mode BN) for a correctness check
# --------------------------------------------------------------------------

def erm_fc_reference(inputs, params, train=True):
    w1, b1 = params["linear1_w"], params["linear1_b"]
    w2, b2 = params["linear2_w"], params["linear2_b"]
    gamma, beta, mean, var = params["bn1"]
    y = inputs @ w1.T + b1
    y = (y - mean) / jnp.sqrt(var + BN_EPS) * gamma + beta
    y = jnp.maximum(y, 0.0)
    y = y @ w2.T + b2
    if not train:
        y = jnp.tanh(jnp.clip(y, -1.0, 1.0))
    return y


# --------------------------------------------------------------------------
# Deterministic synthetic parameters (torch-style Linear / BN1d shapes)
# --------------------------------------------------------------------------

def make_params(key, erm_input_dim, erm_output_dim):
    hidden = erm_input_dim * 20
    ks = jax.random.split(key, 8)

    def _linear(kw, kb, cout, cin):
        bound = 1.0 / math.sqrt(cin)
        w = jax.random.uniform(kw, (cout, cin), jnp.float32, -bound, bound)
        b = jax.random.uniform(kb, (cout,), jnp.float32, -bound, bound)
        return w, b

    l1w, l1b = _linear(ks[0], ks[1], hidden, erm_input_dim)
    l2w, l2b = _linear(ks[2], ks[3], erm_output_dim, hidden)
    gamma = 1.0 + 0.1 * jax.random.normal(ks[4], (hidden,), jnp.float32)
    beta = 0.1 * jax.random.normal(ks[5], (hidden,), jnp.float32)
    mean = 0.1 * jax.random.normal(ks[6], (hidden,), jnp.float32)
    var = jax.random.uniform(ks[7], (hidden,), jnp.float32, 0.5, 1.5)
    return dict(linear1_w=l1w, linear1_b=l1b,
                linear2_w=l2w, linear2_b=l2b,
                bn1=(gamma, beta, mean, var))


if __name__ == "__main__":
    key = jax.random.PRNGKey(0)
    k_x, k_p = jax.random.split(key)

    erm_input_dim = 32           # hidden = 640, consistent with the module
    erm_output_dim = 16
    batch = 2

    params = make_params(k_p, erm_input_dim, erm_output_dim)
    prepared, meta = prepare_params(params)
    x = jax.random.normal(k_x, (batch, erm_input_dim), jnp.float32)

    out_train = erm_fc_forward(x, prepared, meta=meta, train=True)
    out_eval = erm_fc_forward(x, prepared, meta=meta, train=False)
    out_train, out_eval = jax.block_until_ready((out_train, out_eval))

    assert out_train.shape == (batch, erm_output_dim), out_train.shape
    assert out_eval.shape == (batch, erm_output_dim), out_eval.shape
    assert bool(jnp.all(jnp.isfinite(out_train)))
    assert bool(jnp.all(jnp.isfinite(out_eval)))
    # eval branch output must be bounded by tanh(1)
    assert bool(jnp.all(jnp.abs(out_eval) <= math.tanh(1.0) + 1e-5))

    # Numerical check vs. f32 reference (bf16 MXU operands -> generous tol).
    ref_train = erm_fc_reference(x, params, train=True)
    ref_eval = erm_fc_reference(x, params, train=False)
    assert bool(jnp.all(jnp.abs(out_train - ref_train) <=
                        5e-2 + 5e-2 * jnp.abs(ref_train)))
    assert bool(jnp.all(jnp.abs(out_eval - ref_eval) <=
                        5e-2 + 5e-2 * jnp.abs(ref_eval)))

    print("KERNEL_OK")
</pallas_src>

<mosaic_0001>
module attributes {stable_mosaic.version = 11 : i64} {
  func.func @_erm_fc_kernel_single(%arg0: i32, %arg1: memref<2x32xf32, #tpu.memory_space<vmem>>, %arg2: memref<32x640xbf16, #tpu.memory_space<vmem>>, %arg3: memref<1x640xf32, #tpu.memory_space<vmem>>, %arg4: memref<640x128xbf16, #tpu.memory_space<vmem>>, %arg5: memref<1x128xf32, #tpu.memory_space<vmem>>, %arg6: memref<2x128xf32, #tpu.memory_space<vmem>>) attributes {dimension_semantics = [#tpu.dimension_semantics<parallel>], iteration_bounds = array<i64: 1>, scalar_prefetch = 0 : i64, scratch_operands = 0 : i64, tpu.core_type = #tpu.core_type<tc>, window_params = [{transform_indices = @transform_0, window_bounds = array<i64: 2, 32>}, {pipeline_mode = #tpu.pipeline_mode<synchronous>, transform_indices = @transform_1, window_bounds = array<i64: 32, 640>}, {pipeline_mode = #tpu.pipeline_mode<synchronous>, transform_indices = @transform_2, window_bounds = array<i64: 1, 640>}, {pipeline_mode = #tpu.pipeline_mode<synchronous>, transform_indices = @transform_3, window_bounds = array<i64: 640, 128>}, {pipeline_mode = #tpu.pipeline_mode<synchronous>, transform_indices = @transform_4, window_bounds = array<i64: 1, 128>}, {transform_indices = @transform_5, window_bounds = array<i64: 2, 128>}]} {
    %c0 = arith.constant 0 : index
    %c0_0 = arith.constant 0 : index
    %0 = vector.load %arg1[%c0, %c0_0] : memref<2x32xf32, #tpu.memory_space<vmem>>, vector<2x32xf32>
    %1 = arith.truncf %0 : vector<2x32xf32> to vector<2x32xbf16>
    %c0_1 = arith.constant 0 : index
    %c0_2 = arith.constant 0 : index
    %2 = vector.load %arg2[%c0_1, %c0_2] : memref<32x640xbf16, #tpu.memory_space<vmem>>, vector<32x640xbf16>
    %cst = arith.constant dense<0.000000e+00> : vector<2x640xf32>
    %3 = tpu.matmul %1, %2, %cst {dimension_numbers = #tpu.dot_dimension_numbers<[1], [0], [0], [1], [0, 0, 1, 1], [], []>} : vector<2x32xbf16>, vector<32x640xbf16>, vector<2x640xf32> -> vector<2x640xf32>
    %c0_3 = arith.constant 0 : index
    %c0_4 = arith.constant 0 : index
    %4 = vector.load %arg3[%c0_3, %c0_4] : memref<1x640xf32, #tpu.memory_space<vmem>>, vector<1x640xf32>
    %5 = vector.broadcast %4 : vector<1x640xf32> to vector<2x640xf32>
    %6 = arith.addf %3, %5 : vector<2x640xf32>
    %cst_5 = arith.constant 0.000000e+00 : f32
    %7 = vector.broadcast %cst_5 : f32 to vector<2x640xf32>
    %8 = arith.maximumf %6, %7 : vector<2x640xf32>
    %9 = arith.truncf %8 : vector<2x640xf32> to vector<2x640xbf16>
    %c0_6 = arith.constant 0 : index
    %c0_7 = arith.constant 0 : index
    %10 = vector.load %arg4[%c0_6, %c0_7] : memref<640x128xbf16, #tpu.memory_space<vmem>>, vector<640x128xbf16>
    %cst_8 = arith.constant dense<0.000000e+00> : vector<2x128xf32>
    %11 = tpu.matmul %9, %10, %cst_8 {dimension_numbers = #tpu.dot_dimension_numbers<[1], [0], [0], [1], [0, 0, 1, 1], [], []>} : vector<2x640xbf16>, vector<640x128xbf16>, vector<2x128xf32> -> vector<2x128xf32>
    %c0_9 = arith.constant 0 : index
    %c0_10 = arith.constant 0 : index
    %12 = vector.load %arg5[%c0_9, %c0_10] : memref<1x128xf32, #tpu.memory_space<vmem>>, vector<1x128xf32>
    %13 = vector.broadcast %12 : vector<1x128xf32> to vector<2x128xf32>
    %14 = arith.addf %11, %13 : vector<2x128xf32>
    %c0_11 = arith.constant 0 : index
    %c0_12 = arith.constant 0 : index
    %15 = vector.load %arg6[%c0_11, %c0_12] : memref<2x128xf32, #tpu.memory_space<vmem>>, vector<2x128xf32>
    tpu.vector_store %arg6[%c0_11, %c0_12], %14 {strides = array<i32>} : memref<2x128xf32, #tpu.memory_space<vmem>>, vector<2x128xf32>,
    return
  }
  func.func @transform_0(%arg0: i32) -> (i32, i32) {
    %c0_i32 = arith.constant 0 : i32
    %c0_i32_0 = arith.constant 0 : i32
    return %arg0, %c0_i32 : i32, i32
  }
  func.func @transform_1(%arg0: i32) -> (i32, i32) {
    %c0_i32 = arith.constant 0 : i32
    %c0_i32_0 = arith.constant 0 : i32
    %c0_i32_1 = arith.constant 0 : i32
    return %c0_i32, %c0_i32_0 : i32, i32
  }
  func.func @transform_2(%arg0: i32) -> (i32, i32) {
    %c0_i32 = arith.constant 0 : i32
    %c0_i32_0 = arith.constant 0 : i32
    %c0_i32_1 = arith.constant 0 : i32
    return %c0_i32, %c0_i32_0 : i32, i32
  }
  func.func @transform_3(%arg0: i32) -> (i32, i32) {
    %c0_i32 = arith.constant 0 : i32
    %c0_i32_0 = arith.constant 0 : i32
    %c0_i32_1 = arith.constant 0 : i32
    return %c0_i32, %c0_i32_0 : i32, i32
  }
  func.func @transform_4(%arg0: i32) -> (i32, i32) {
    %c0_i32 = arith.constant 0 : i32
    %c0_i32_0 = arith.constant 0 : i32
    %c0_i32_1 = arith.constant 0 : i32
    return %c0_i32, %c0_i32_0 : i32, i32
  }
  func.func @transform_5(%arg0: i32) -> (i32, i32) {
    %c0_i32 = arith.constant 0 : i32
    %c0_i32_0 = arith.constant 0 : i32
    return %arg0, %c0_i32 : i32, i32
  }
}

</mosaic_0001>

<bundles_post_ra>
// kernel: erm_fc_forward.1
= control target key start
LH: loop header
LB: loop body
LE: loop exit
PB: predicated region body
PF: predicated region fallthrough
CT: control target
= control target key end

     0   :  { %10 = vsyncpa [#allocation3], 0  ;;  %s1211_s0 = inlined_call_operand.hbm [shape: f32[2,32], index: 0, kind: input, shape index: {}]   ;;  %s1212_s1 = inlined_call_operand.hbm [shape: bf16[32,640], index: 1, kind: input, shape index: {}]   ;;  %s1213_s2 = inlined_call_operand.hbm [shape: f32[1,640], index: 2, kind: input, shape index: {}]   ;;  %s1214_s3 = inlined_call_operand.hbm [shape: bf16[640,128], index: 3, kind: input, shape index: {}]   ;;  %s1215_s4 = inlined_call_operand.vmem [shape: f32[1,128], index: 4, kind: input, shape index: {}]   ;;  %s1216_s5 = inlined_call_operand.hbm [shape: f32[2,128], index: 5, kind: output, shape index: {}]  }
   0x1   :  { %11 = vsyncpa [#allocation6], 0 }
   0x2   :  { %12 = vsyncpa [#allocation9], 0 }
   0x3   :  { %13 = vsyncpa [#allocation4], 0  ;;  %s1089_s18 = smov [#allocation5]   ;;  %s971_s22 = scalar_lea.hbm %s1212_s1, 1280 }
   0x4   :  { %s29_s19 = sshll.u32 %s1089_s18, 4  ;;  %p972_p0 = scmp.ne.s32.totalorder %s1212_s1, %s971_s22  ;;  %s30_s19 = int_to_ptr.vmem [resolvable:$true] %s29_s19 }
   0x5   :  { %p975_p1 = scmp.lt.u32.totalorder %s971_s22, %s1212_s1 }
   0x7   :  { %p977_p2 = pnand %p975_p1, %p972_p0 }
   0x9   :  { %980 = shalt.err (!%p977_p2)
}
   0xa   :  { %s981_s27 = scalar_lea.vmem %s30_s19, 1280  ;;  %p986_p4 = scmp.lt.s32.totalorder %s30_s19, %s30_s19 }
   0xb   :  { %p982_p3 = scmp.ne.s32.totalorder %s30_s19, %s981_s27  ;;  %p987_p5 = scmp.lt.s32.totalorder %s981_s27, %s981_s27 }
   0xd   :  { %p988_p6 = por %p987_p5, %p986_p4 }
   0xf   :  { %p989_p7 = pnand %p988_p6, %p982_p3 }
  0x11   :  { %992 = shalt.err (!%p989_p7)
}
  0x12   :  { %s1090_s28 = smov 320   ;;  %s1091_s29 = smov 20  }
  0x13   :  { %35 = dma.hbm_to_vmem [thread:$0]  %s1212_s1, 1280, %s30_s19, [#allocation6], %s1090_s28, %s1090_s28, %s1091_s29  }
  0x14   :  { %s1092_s7 = smov [#allocation2]   ;;  %s1093_s9 = smov [#allocation7]  }
  0x15   :  { %s20_s8 = sshll.u32 %s1092_s7, 4  ;;  %s42_s10 = sshll.u32 %s1093_s9, 4  ;;  %s21_s8 = int_to_ptr.vmem [resolvable:$true] %s20_s8  ;;  %s43_s10 = int_to_ptr.vmem [resolvable:$true] %s42_s10 }
  0x16   :  { %s993_s13 = scalar_lea.hbm %s1211_s0, 32 }
  0x17   :  { %p994_p8 = scmp.ne.s32.totalorder %s1211_s0, %s993_s13  ;;  %p997_p9 = scmp.lt.u32.totalorder %s993_s13, %s1211_s0 }
  0x19   :  { %p999_p10 = pnand %p997_p9, %p994_p8 }
  0x1b   :  { %1002 = shalt.err (!%p999_p10)
}
  0x1c   :  { %s1003_s1 = scalar_lea.vmem %s21_s8, 32  ;;  %p1008_p12 = scmp.lt.s32.totalorder %s21_s8, %s21_s8 }
  0x1d   :  { %p1004_p11 = scmp.ne.s32.totalorder %s21_s8, %s1003_s1  ;;  %p1009_p13 = scmp.lt.s32.totalorder %s1003_s1, %s1003_s1 }
  0x1f   :  { %p1010_p0 = por %p1009_p13, %p1008_p12 }
  0x21   :  { %p1011_p1 = pnand %p1010_p0, %p1004_p11 }
  0x23   :  { %1014 = shalt.err (!%p1011_p1)
}
  0x24   :  { %23 = dma.hbm_to_vmem [thread:$0]  %s1211_s0, 32, %s21_s8, [#allocation3]  }
  0x25   :  { %s1015_s22 = scalar_lea.hbm %s1213_s2, 80 }
  0x26   :  { %p1016_p2 = scmp.ne.s32.totalorder %s1213_s2, %s1015_s22  ;;  %p1019_p3 = scmp.lt.u32.totalorder %s1015_s22, %s1213_s2 }
  0x28   :  { %p1021_p4 = pnand %p1019_p3, %p1016_p2 }
  0x2a   :  { %1024 = shalt.err (!%p1021_p4)
}
  0x2b   :  { %s1025_s27 = scalar_lea.vmem %s43_s10, 80  ;;  %s1029_s28 = scalar_lea.vmem %s43_s10, 96 }
  0x2c   :  { %p1026_p5 = scmp.ne.s32.totalorder %s43_s10, %s1025_s27  ;;  %p1030_p6 = scmp.lt.s32.totalorder %s43_s10, %s43_s10 }
  0x2d   :  { %p1031_p7 = scmp.lt.s32.totalorder %s1029_s28, %s1025_s27 }
  0x2f   :  { %p1032_p8 = por %p1031_p7, %p1030_p6 }
  0x31   :  { %p1033_p9 = pnand %p1032_p8, %p1026_p5 }
  0x33   :  { %1036 = shalt.err (!%p1033_p9)
}
  0x34   :  { %45 = dma.hbm_to_vmem [thread:$0]  %s1213_s2, 80, %s43_s10, [#allocation6]  }
  0x35   :  { %s1094_s30 = smov [#allocation8]   ;;  %s1037_s9 = scalar_lea.hbm %s1214_s3, 5120 }
  0x36   :  { %s51_s6 = sshll.u32 %s1094_s30, 4  ;;  %p1038_p10 = scmp.ne.s32.totalorder %s1214_s3, %s1037_s9  ;;  %s52_s6 = int_to_ptr.vmem [resolvable:$true] %s51_s6 }
  0x37   :  { %p1041_p11 = scmp.lt.u32.totalorder %s1037_s9, %s1214_s3 }
  0x39   :  { %p1043_p12 = pnand %p1041_p11, %p1038_p10 }
  0x3b   :  { %1046 = shalt.err (!%p1043_p12)
}
  0x3c   :  { %s1047_s15 = scalar_lea.vmem %s52_s6, 5120  ;;  %p1052_p0 = scmp.lt.s32.totalorder %s52_s6, %s52_s6 }
  0x3d   :  { %p1048_p13 = scmp.ne.s32.totalorder %s52_s6, %s1047_s15  ;;  %p1053_p1 = scmp.lt.s32.totalorder %s1047_s15, %s1047_s15 }
  0x3f   :  { %p1054_p2 = por %p1053_p1, %p1052_p0 }
  0x41   :  { %p1055_p3 = pnand %p1054_p2, %p1048_p13 }
  0x43   :  { %1058 = shalt.err (!%p1055_p3)
}
  0x44   :  { %s1095_s2 = smov 64   ;;  %s1096_s10 = smov 4  }
  0x45   :  { %57 = dma.hbm_to_vmem [thread:$0]  %s1214_s3, 5120, %s52_s6, [#allocation9], %s1095_s2, %s1095_s2, %s1096_s10  }
  0x46   :  { %1081 = dma.done.wait [#allocation3], 32  }
  0x47   :  { %1082 = vsyncadd [#allocation3], 4294967264 }
  0x48   :  { %1083 = dma.done.wait [#allocation6], 1360  }
  0x49   :  { %1084 = vsyncadd [#allocation6], 4294965936 }
  0x4a   :  { %1085 = dma.done.wait [#allocation9], 5120  }
  0x4b   :  { %1086 = vsyncadd [#allocation9], 4294962176  ;;  %v1097_v0 = vmov 0   ;;  %v917_v1 = vld [vmem:[#allocation5 + $0x4] ss:$20 sps:$4 sm:$0xff]   ;;  %vm166_vm0 = vcmask 261120   ;;  %v89_v46 = vlaneseq }
  0x4c   :  { %202 = vmatprep.mubr.bf16.mxu0 %v1097_v0  ;;  %v919_v2 = vld [vmem:[#allocation5] ss:$20 sps:$4 sm:$0xff]   ;;  %170 = vmatprep.subr.bf16.mxu0 %v917_v1  ;;  %v922_v4 = vld [vmem:[#allocation5 + $0x28] ss:$20 sps:$4 sm:$0xff]   ;;  %v926_v13 = vld [vmem:[#allocation5 + $0x30] ss:$20 sps:$4 sm:$0xff]  }
  0x4d   :  { %v920_v3 = vld [vmem:[#allocation5 + $0x2c] ss:$20 sps:$4 sm:$0xff]   ;;  %171 = vmatpush1.bf16.msra.mxu0 %v919_v2  ;;  %v73_v5 = vld [vmem:[#allocation2] sm:$0x3]  ;;  %v928_v9 = vld [vmem:[#allocation5 + $0x34] ss:$20 sps:$4 sm:$0xff]  }
  0x4e   :  { %172 = vmatprep.subr.bf16.mxu0 %v920_v3  ;;  %v925_v6 = vld [vmem:[#allocation5 + $0xc] ss:$20 sps:$4 sm:$0xff]   ;;  %v74_v7 = vpack.c.bf16 %v73_v5, %v73_v5  ;;  %v923_v8 = vld [vmem:[#allocation5 + $0x8] ss:$20 sps:$4 sm:$0xff]   ;;  %v929_v16 = vld [vmem:[#allocation5 + $0x10] ss:$20 sps:$4 sm:$0xff]  }
  0x4f   :  { %v931_v10 = vld [vmem:[#allocation8 + $0x40] sm:$0xff]   ;;  %v933_v12 = vld [vmem:[#allocation8 + $0x48] sm:$0xff]   ;;  %v935_v15 = vld [vmem:[#allocation8 + $0x50] sm:$0xff]   ;;  %v1098_v17 = vmov 0.0   ;;  %vm1099_vm1 = vmmov 0   ;;  %v90_v47 = vshrl.u32 %v89_v46, 7 }
  0x50   :  { %v932_v11 = vld [vmem:[#allocation8] sm:$0xff]   ;;  %824 = vmatprep.subr.bf16.mxu1 %v931_v10  ;;  %v934_v14 = vld [vmem:[#allocation8 + $0x8] sm:$0xff]   ;;  %v936_v18 = vld [vmem:[#allocation8 + $0x10] sm:$0xff]   ;;  %s1100_s18 = smov [#allocation10]  }
  0x51   :  { %173 = vmatpush1.bf16.msra.mxu0 %v922_v4  ;;  %825 = vmatpush3.bf16.msra.mxu1 %v932_v11  ;;  %v939_v19 = vld [vmem:[#allocation8 + $0x58] sm:$0xff]   ;;  %v937_v21 = vld [vmem:[#allocation8 + $0xc0] sm:$0xff]   ;;  %v941_v25 = vld [vmem:[#allocation8 + $0xc8] sm:$0xff]   ;;  %v91_v48 = vsub.s32 0, %v90_v47  ;;  %v95_v50 = vsub.s32 1, %v90_v47  ;;  %v99_v56 = vsub.s32 2, %v90_v47 }
  0x52   :  { %211 = vmatprep.subr.bf16.mxu0 %v925_v6  ;;  %826 = vmatprep.subr.bf16.mxu1 %v933_v12  ;;  %v930_v20 = vld [vmem:[#allocation5 + $0x38] ss:$20 sps:$4 sm:$0xff]   ;;  %v947_v27 = vld [vmem:[#allocation8 + $0x68] sm:$0xff]   ;;  %v87_v49 = vld [vmem:[#allocation7] sm:$0x1f]  ;;  %v103_v59 = vsub.s32 3, %v90_v47 }
  0x53   :  { %v940_v22 = vld [vmem:[#allocation8 + $0x18] sm:$0xff]   ;;  %v943_v23 = vld [vmem:[#allocation8 + $0x60] sm:$0xff]   ;;  %v942_v28 = vld [vmem:[#allocation8 + $0x88] sm:$0xff]   ;;  %v92_v51 = vrot.slane %v87_v49, %v91_v48  ;;  %v96_v52 = vrot.slane %v87_v49, %v95_v50  ;;  %v100_v63 = vrot.slane %v87_v49, %v99_v56  ;;  %s756_s19 = sshll.u32 %s1100_s18, 4  ;;  %s757_s19 = int_to_ptr.vmem [resolvable:$true] %s756_s19 }
  0x54   :  { %777 = vmatmul.mubr.msk.bf16.vlgmr.msra.gmra.mrb[0].mxu0 %vm166_vm0, %v74_v7  ;;  %v938_v24 = vld [vmem:[#allocation8 + $0x80] sm:$0xff]   ;;  %v945_v29 = vld [vmem:[#allocation8 + $0xd0] sm:$0xff]   ;;  %v948_v30 = vld [vmem:[#allocation8 + $0x28] sm:$0xff]   ;;  %v104_v1 = vrot.slane %v87_v49, %v103_v59  ;;  %s1059_s20 = scalar_lea.vmem %s757_s19, 32  ;;  %p1064_p5 = scmp.lt.s32.totalorder %s757_s19, %s757_s19 }
  0x55   :  { %212 = vmatpush1.bf16.msra.mxu0 %v923_v8  ;;  %243 = vmatprep.mubr.bf16.mxu0 %v1097_v0  ;;  %v944_v26 = vld [vmem:[#allocation8 + $0x20] sm:$0xff]   ;;  %v946_v31 = vld [vmem:[#allocation8 + $0x90] sm:$0xff]   ;;  %v949_v32 = vld [vmem:[#allocation8 + $0xd8] sm:$0xff]   ;;  %p1060_p4 = scmp.ne.s32.totalorder %s757_s19, %s1059_s20  ;;  %p1065_p6 = scmp.lt.s32.totalorder %s1059_s20, %s1059_s20 }
  0x56   :  { %213 = vmatprep.subr.bf16.mxu0 %v928_v9  ;;  %827 = vmatpush3.bf16.msra.mxu1 %v934_v14  ;;  %v950_v33 = vld [vmem:[#allocation8 + $0x98] sm:$0xff]   ;;  %v951_v34 = vld [vmem:[#allocation8 + $0x70] sm:$0xff]   ;;  %v953_v36 = vld [vmem:[#allocation8 + $0xe0] sm:$0xff]  }
  0x57   :  { %828 = vmatprep.subr.bf16.mxu1 %v935_v15  ;;  %v952_v35 = vld [vmem:[#allocation8 + $0x30] sm:$0xff]   ;;  %v954_v37 = vld [vmem:[#allocation8 + $0xa0] sm:$0xff]   ;;  %v955_v38 = vld [vmem:[#allocation8 + $0x78] sm:$0xff]   ;;  %p1066_p7 = por %p1065_p6, %p1064_p5 }
  0x58   :  { %v956_v39 = vld [vmem:[#allocation8 + $0x38] sm:$0xff]   ;;  %v957_v40 = vld [vmem:[#allocation8 + $0xe8] sm:$0xff]   ;;  %v959_v42 = vld [vmem:[#allocation8 + $0xf0] sm:$0xff]  }
  0x59   :  { %214 = vmatpush1.bf16.msra.mxu0 %v926_v13  ;;  %v958_v41 = vld [vmem:[#allocation8 + $0xa8] sm:$0xff]   ;;  %v961_v43 = vld [vmem:[#allocation8 + $0xb0] sm:$0xff]   ;;  %v962_v44 = vld [vmem:[#allocation8 + $0xf8] sm:$0xff]   ;;  %p1067_p8 = pnand %p1066_p7, %p1060_p4 }
  0x5a   :  { %877 = vmatprep.subr.bf16.mxu0 %v1098_v17  ;;  %829 = vmatpush3.bf16.msra.mxu1 %v936_v18  ;;  %v964_v45 = vld [vmem:[#allocation8 + $0xb8] sm:$0xff]   ;;  %v960_v2 = vld [vmem:[#allocation8 + $0x100] sm:$0xff]   ;;  %v963_v8 = vld [vmem:[#allocation8 + $0x108] sm:$0xff]  }
  0x5b   :  { %830 = vmatprep.subr.bf16.mxu1 %v939_v19  ;;  %v965_v15 = vld [vmem:[#allocation8 + $0x110] sm:$0xff]   ;;  %v966_v19 = vld [vmem:[#allocation8 + $0x118] sm:$0xff]  }
  0x5c   :  { %778 = vmatmul.mubr.msk.bf16.vlgmr.msra.gmra.mrb[4].mxu0 %vm166_vm0, %v74_v7 }
  0x5d   :  { %878 = vmatpush3.bf16.msra.mxu0 %v929_v16  ;;  %881 = vmatprep.mubr.msk.bf16.mxu0 %vm1099_vm1, %v1098_v17 }
  0x5e   :  { %879 = vmatprep.subr.bf16.mxu0 %v1098_v17  ;;  %831 = vmatpush3.bf16.msra.mxu1 %v940_v22  ;;  %v107_v22 = vsub.s32 4, %v90_v47 }
  0x5f   :  { %832 = vmatprep.subr.bf16.mxu1 %v943_v23  ;;  %v967_v23 = vld [vmem:[#allocation8 + $0x120] sm:$0xff]  }
  0x61   :  { %880 = vmatpush3.bf16.msra.mxu0 %v930_v20 }
  0x62   :  { %846 = vmatprep.subr.bf16.mxu0 %v937_v21  ;;  %833 = vmatpush3.bf16.msra.mxu1 %v944_v26 }
  0x63   :  { %834 = vmatprep.subr.bf16.mxu1 %v947_v27  ;;  %v969_v27 = vld [vmem:[#allocation8 + $0x130] sm:$0xff]  }
  0x64   :  { %882 = vmatmul.mubr.msk.bf16.vlgmr.msra.gmra.mrb[8].mxu0 %vm166_vm0, %v74_v7 }
  0x65   :  { %847 = vmatpush3.bf16.msra.mxu0 %v938_v24  ;;  %v108_v24 = vrot.slane %v87_v49, %v107_v22 }
  0x66   :  { %848 = vmatprep.subr.bf16.mxu0 %v941_v25  ;;  %835 = vmatpush3.bf16.msra.mxu1 %v948_v30  ;;  %v968_v25 = vld [vmem:[#allocation8 + $0x128] sm:$0xff]  }
  0x67   :  { %836 = vmatprep.subr.bf16.mxu1 %v951_v34 }
  0x69   :  { %849 = vmatpush3.bf16.msra.mxu0 %v942_v28 }
  0x6a   :  { %850 = vmatprep.subr.bf16.mxu0 %v945_v29  ;;  %837 = vmatpush3.bf16.msra.mxu1 %v952_v35  ;;  %v970_v29 = vld [vmem:[#allocation8 + $0x138] sm:$0xff]  }
  0x6b   :  { %838 = vmatprep.subr.bf16.mxu1 %v955_v38 }
  0x6d   :  { %851 = vmatpush3.bf16.msra.mxu0 %v946_v31 }
  0x6e   :  { %852 = vmatprep.subr.bf16.mxu0 %v949_v32  ;;  %839 = vmatpush3.bf16.msra.mxu1 %v956_v39 }
  0x6f   :  { %885 = vmatprep.subr.bf16.mxu1 %v1098_v17 }
  0x71   :  { %853 = vmatpush3.bf16.msra.mxu0 %v950_v33 }
  0x72   :  { %854 = vmatprep.subr.bf16.mxu0 %v953_v36  ;;  %v780_v36 = vld [vmem:[%s1215_s4] ss:$0 sm:$0xff] }
  0x75   :  { %855 = vmatpush3.bf16.msra.mxu0 %v954_v37 }
  0x76   :  { %856 = vmatprep.subr.bf16.mxu0 %v957_v40 }
  0x79   :  { %857 = vmatpush3.bf16.msra.mxu0 %v958_v41 }
  0x7a   :  { %858 = vmatprep.subr.bf16.mxu0 %v959_v42 }
  0x7d   :  { %859 = vmatpush3.bf16.msra.mxu0 %v961_v43 }
  0x7e   :  { %860 = vmatprep.subr.bf16.mxu0 %v962_v44 }
  0x81   :  { %861 = vmatpush3.bf16.msra.mxu0 %v964_v45 }
 0x127   :  { %v204_v53 = vpop.f32.mrb[0].mxu0 }
 0x128   :  { %v205_v54 = vadd.f32 %v204_v53, %v92_v51  ;;  %v206_v55 = vpop.f32.mrb[1].mxu0 }
 0x129   :  { %v207_v57 = vadd.f32 %v206_v55, %v96_v52  ;;  %v208_v58 = vpop.f32.mrb[2].mxu0 }
 0x12a   :  { %v292_v60 = vmax.f32 %v205_v54, 0.0  ;;  %v209_v61 = vpop.f32.mrb[3].mxu0 }
 0x12b   :  { %v293_v62 = vmax.f32 %v207_v57, 0.0 }
 0x12c   :  { %v297_v3 = vpack.c.bf16 %v292_v60, %v292_v60 }
 0x12d   :  { %v298_v0 = vpack.c.bf16 %v293_v62, %v293_v62 }
 0x12f   :  { %v245_v4 = vpop.f32.mrb[4].mxu0  ;;  %661 = vmatprep.mubr.bf16.mxu1 %v298_v0 }
 0x130   :  { %v246_v5 = vadd.f32 %v245_v4, %v100_v63  ;;  %v247_v6 = vpop.f32.mrb[5].mxu0  ;;  %662 = vmatmul.mubr.bf16.vlgmr.msra.gmra.mrb[0].mxu1 %v297_v3 }
 0x131   :  { %v248_v7 = vadd.f32 %v247_v6, %v104_v1  ;;  %886 = vmatpush3.bf16.msra.mxu1 %v960_v2  ;;  %v249_v9 = vpop.f32.mrb[6].mxu0  ;;  %901 = vmatprep.mubr.msk.bf16.mxu1 %vm1099_vm1, %v1098_v17 }
 0x132   :  { %v294_v10 = vmax.f32 %v246_v5, 0.0  ;;  %887 = vmatprep.subr.bf16.mxu1 %v1098_v17  ;;  %v250_v11 = vpop.f32.mrb[7].mxu0 }
 0x133   :  { %v295_v12 = vmax.f32 %v248_v7, 0.0 }
 0x134   :  { %v299_v13 = vpack.c.bf16 %v294_v10, %v294_v10 }
 0x135   :  { %v300_v14 = vpack.c.bf16 %v295_v12, %v295_v12  ;;  %888 = vmatpush3.bf16.msra.mxu1 %v963_v8 }
 0x136   :  { %889 = vmatprep.subr.bf16.mxu1 %v1098_v17 }
 0x137   :  { %701 = vmatprep.mubr.bf16.mxu0 %v300_v14  ;;  %v286_v16 = vpop.f32.mrb[8].mxu0 }
 0x138   :  { %702 = vmatmul.mubr.bf16.vlgmr.msra.gmra.mrb[12].mxu0 %v299_v13  ;;  %v883_v18 = vpop.f32.mrb[9].mxu0  ;;  %v287_v26 = vadd.f32 %v286_v16, %v108_v24 }
 0x139   :  { %890 = vmatpush3.bf16.msra.mxu1 %v965_v15  ;;  %v289_v20 = vpop.f32.mrb[10].mxu0 }
 0x13a   :  { %891 = vmatprep.subr.bf16.mxu1 %v1098_v17  ;;  %v884_v21 = vpop.f32.mrb[11].mxu0  ;;  %v296_v28 = vmax.f32 %v287_v26, 0.0 }
 0x13c   :  { %v301_v30 = vpack.c.bf16 %v296_v28, %v296_v28 }
 0x13d   :  { %892 = vmatpush3.bf16.msra.mxu1 %v966_v19 }
 0x13e   :  { %893 = vmatprep.subr.bf16.mxu1 %v1098_v17 }
 0x141   :  { %894 = vmatpush3.bf16.msra.mxu1 %v967_v23 }
 0x142   :  { %895 = vmatprep.subr.bf16.mxu1 %v1098_v17 }
 0x145   :  { %896 = vmatpush3.bf16.msra.mxu1 %v968_v25 }
 0x146   :  { %897 = vmatprep.subr.bf16.mxu1 %v1098_v17 }
 0x149   :  { %898 = vmatpush3.bf16.msra.mxu1 %v969_v27 }
 0x14a   :  { %899 = vmatprep.subr.bf16.mxu1 %v1098_v17 }
 0x14d   :  { %900 = vmatpush3.bf16.msra.mxu1 %v970_v29 }
 0x150   :  { %902 = vmatmul.mubr.bf16.vlgmr.msra.gmra.mrb[4].mxu1 %v301_v30 }
 0x203   :  { %v840_v31 = vpop.f32.mrb[0].mxu1 }
 0x204   :  { %v841_v32 = vpop.f32.mrb[1].mxu1 }
 0x205   :  { %v842_v33 = vadd.f32 %v841_v32, %v840_v31  ;;  %v843_v34 = vpop.f32.mrb[2].mxu1 }
 0x206   :  { %v844_v35 = vpop.f32.mrb[3].mxu1 }
 0x207   :  { %v664_v39 = vadd.f32 %v842_v33, %v780_v36 }
 0x20b   :  { %v862_v37 = vpop.f32.mrb[12].mxu0 }
 0x20c   :  { %v863_v38 = vpop.f32.mrb[13].mxu0 }
 0x20d   :  { %v864_v40 = vadd.f32 %v863_v38, %v862_v37  ;;  %v865_v41 = vpop.f32.mrb[14].mxu0 }
 0x20e   :  { %v866_v42 = vpop.f32.mrb[15].mxu0 }
 0x20f   :  { %v704_v43 = vadd.f32 %v864_v40, %v664_v39 }
 0x223   :  { %v743_v17 = vpop.f32.mrb[4].mxu1 }
 0x224   :  { %v744_v44 = vadd.f32 %v743_v17, %v704_v43  ;;  %v903_v45 = vpop.f32.mrb[5].mxu1 }
 0x225   :  { %v746_v46 = vpop.f32.mrb[6].mxu1 }
 0x226   :  { %749 = vst [vmem:[#allocation10] sm:$0x3] %v744_v44  ;;  %v904_v47 = vpop.f32.mrb[7].mxu1 }
 0x227   :  { %1070 = shalt.err (!%p1067_p8)
}
 0x228   :  { %s1071_s22 = scalar_lea.hbm %s1216_s5, 32 }
 0x229   :  { %p1072_p9 = scmp.ne.s32.totalorder %s1216_s5, %s1071_s22  ;;  %p1075_p10 = scmp.lt.u32.totalorder %s1071_s22, %s1216_s5 }
 0x22b   :  { %p1077_p11 = pnand %p1075_p10, %p1072_p9 }
 0x22d   :  { %1080 = shalt.err (!%p1077_p11)
}
 0x22e   :  { %759 = dma.vmem_to_hbm [thread:$0]  %s757_s19, 32, %s1216_s5, [#allocation4]  }
 0x22f   :  { %1087 = dma.done.wait [#allocation4], 32  }
 0x230   :  { %1088 = vsyncadd [#allocation4], 4294967264 }
 0x231   :  { %763 = vsyncpa [#allocation3], 1 }
 0x232   :  { %764 = vsyncpa [#allocation6], 1 }
 0x233   :  { %765 = vsyncpa [#allocation9], 1 }
 0x234   :  { %766 = vsyncpa [#allocation4], 1 }

</bundles_post_ra>
